<compile_context>
chip_gen: v7x
topology: tpu7x:2x2x1
jax: 0.10.0
libtpu: 0.0.40
codegen_flags: <defaults>
</compile_context>

<pallas_src>
import functools

import jax
import jax.numpy as jnp
import numpy as np
from jax.experimental import pallas as pl
from jax.experimental.pallas import tpu as pltpu

_STAT_LANES = 128  # lane-replicated softmax statistics -> full-width vregs


def _rep_cols(x_rep, n):
    """Broadcast a lane-replicated (rows, W) array to (rows, n) columns.

    When n is a multiple of W this is a full-width tile (no masked lanes);
    otherwise (tiny demo shapes) fall back to a single-column broadcast.
    """
    w = x_rep.shape[-1]
    if n == w:
        return x_rep
    if n % w == 0:
        return jnp.tile(x_rep, (1, n // w))
    return jnp.broadcast_to(x_rep[:, :1], (x_rep.shape[0], n))


def _sdpa_kernel(q_ref, kt_ref, v_ref, o_ref, q_sc, m_sc, l_sc, acc_sc, *, scale):
    """One (batch, q_tile, kv_tile) grid step of online-softmax attention.

    Blocks (batch dim squeezed):
      q_ref  : (tq, D)    f32/bf16
      kt_ref : (D,  tk)   K pre-transposed -> MXU-native contraction
      v_ref  : (tk, Dv)
      o_ref  : (tq, Dv)
    Scratch (persist across the kv axis):
      q_sc   : (tq, D)    bf16, pre-scaled Q (written once per q tile)
      m_sc   : (tq, 128)  f32, running max, lane-replicated
      l_sc   : (tq, 128)  f32, running denominator, lane-replicated
      acc_sc : (tq, Dv)   f32, running numerator
    """
    ki = pl.program_id(2)
    tk = kt_ref.shape[-1]
    dv = v_ref.shape[-1]

    @pl.when(ki == 0)
    def _init():
        q = q_ref[...]
        if scale is not None:                    # trace-time constant
            q = q * jnp.float32(scale)           # fold scale into Q (tq*D, once)
        q_sc[...] = q.astype(jnp.bfloat16)
        m_sc[...] = jnp.full_like(m_sc, -jnp.inf)
        l_sc[...] = jnp.zeros_like(l_sc)
        acc_sc[...] = jnp.zeros_like(acc_sc)

    # QK^T on the MXU with bf16 operands, f32 accumulation.
    s = jnp.dot(q_sc[...], kt_ref[...].astype(jnp.bfloat16),
                preferred_element_type=jnp.float32)          # (tq, tk) f32

    m_prev = m_sc[...]                                       # (tq, 128)
    m_curr = s.max(axis=-1, keepdims=True)                   # (tq, 1)
    m_next = jnp.maximum(m_prev, m_curr)                     # (tq, 128)
    alpha = jnp.exp(m_prev - m_next)                         # full-width VPU
    p = jnp.exp(s - _rep_cols(m_next, tk))                   # (tq, tk)

    l_sc[...] = alpha * l_sc[...] + p.sum(axis=-1, keepdims=True)
    acc_sc[...] = _rep_cols(alpha, dv) * acc_sc[...] + jnp.dot(
        p.astype(jnp.bfloat16), v_ref[...].astype(jnp.bfloat16),
        preferred_element_type=jnp.float32)
    m_sc[...] = m_next

    @pl.when(ki == pl.num_programs(2) - 1)
    def _finalize():
        inv_l = pl.reciprocal(l_sc[...], approx=True)        # EUP, nearly free
        o_ref[...] = (acc_sc[...] * _rep_cols(inv_l, dv)).astype(o_ref.dtype)


def _pick_tile(length, candidates):
    for t in candidates:
        if length % t == 0:
            return t
    return length   # small / ragged lengths: full extent is a legal block shape


def scaled_dot_product_attention(q, k, v, scale=None, *, tq=None, tk=None):
    """context = softmax(Q @ K^T [* scale], axis=-1) @ V  (per batch)."""
    B, Lq, D = q.shape
    Bk, Lk, Dk = k.shape
    Bv, Lv, Dv = v.shape
    assert B == Bk == Bv and Dk == D and Lv == Lk

    # Cap the score-tile size: (tq, tk) f32 score/prob tiles must stay well
    # inside the 256 KiB vreg file (never 512x512).
    tq = _pick_tile(Lq, (256, 128)) if tq is None else tq
    tk = _pick_tile(Lk, (128, 256)) if tk is None else tk
    assert Lq % tq == 0 and Lk % tk == 0

    # Mirror PyTorch's `if scale:` truthiness (None / 0.0 -> no scaling).
    scale = float(scale) if scale else None
    kernel = functools.partial(_sdpa_kernel, scale=scale)

    # Present K transposed (B, D, Lk): keys lane-dense, contraction MXU-native,
    # no in-kernel transpose.  Wrapper-side transpose is layout plumbing.
    kt = jnp.swapaxes(k, 1, 2)

    # TODO(synk): for production multi-head shapes with Dv < 128, fold heads
    # into the last dim in the wrapper so the output stores stay lane-dense.

    grid = (B, Lq // tq, Lk // tk)
    return pl.pallas_call(
        kernel,
        out_shape=jax.ShapeDtypeStruct((B, Lq, Dv), q.dtype),
        grid_spec=pltpu.PrefetchScalarGridSpec(
            num_scalar_prefetch=0,
            grid=grid,
            in_specs=[
                pl.BlockSpec((pl.Squeezed(), tq, D), lambda b, qi, ki: (b, qi, 0)),
                pl.BlockSpec((pl.Squeezed(), D, tk), lambda b, qi, ki: (b, 0, ki)),
                pl.BlockSpec((pl.Squeezed(), tk, Dv), lambda b, qi, ki: (b, ki, 0)),
            ],
            out_specs=pl.BlockSpec((pl.Squeezed(), tq, Dv),
                                   lambda b, qi, ki: (b, qi, 0)),
            scratch_shapes=[
                pltpu.VMEM((tq, D), jnp.bfloat16),            # pre-scaled Q
                pltpu.VMEM((tq, _STAT_LANES), jnp.float32),   # running max  m
                pltpu.VMEM((tq, _STAT_LANES), jnp.float32),   # running sum  l
                pltpu.VMEM((tq, Dv), jnp.float32),            # running numerator
            ],
        ),
        compiler_params=pltpu.CompilerParams(
            dimension_semantics=("parallel", "parallel", "arbitrary")),
    )(q, kt, v)


def _reference(q, k, v, scale=None):
    s = jnp.einsum("bqd,bkd->bqk", q, k).astype(jnp.float32)
    if scale:
        s = s * scale
    p = jax.nn.softmax(s, axis=-1)
    return jnp.einsum("bqk,bkd->bqd", p, v.astype(jnp.float32)).astype(q.dtype)


if __name__ == "__main__":
    # --- small shapes consistent with the module -----------------------------
    batch, seq, dim = 2, 8, 32
    kq, kk, kv = jax.random.split(jax.random.PRNGKey(0), 3)
    Q = jax.random.normal(kq, (batch, seq, dim), dtype=jnp.float32)
    K = jax.random.normal(kk, (batch, seq, dim), dtype=jnp.float32)
    V = jax.random.normal(kv, (batch, seq, dim), dtype=jnp.float32)
    scale = dim ** -0.5   # the Transformer model passes K.size(-1) ** -0.5

    out = jax.block_until_ready(scaled_dot_product_attention(Q, K, V, scale))
    ref = _reference(Q, K, V, scale)
    # bf16 MXU operands -> slightly looser tolerance than a pure-f32 kernel
    np.testing.assert_allclose(np.asarray(out), np.asarray(ref),
                               rtol=3e-2, atol=3e-2)

    # no-scale path (mirrors `if scale:` being falsy in the PyTorch forward).
    # Smaller-magnitude Q/K keep the unscaled logits O(1) so the bf16 check
    # stays tight while still exercising the no-scale code path.
    Qs, Ks = Q * 0.25, K * 0.25
    out_ns = jax.block_until_ready(scaled_dot_product_attention(Qs, Ks, V, None))
    ref_ns = _reference(Qs, Ks, V, None)
    np.testing.assert_allclose(np.asarray(out_ns), np.asarray(ref_ns),
                               rtol=3e-2, atol=3e-2)

    # --- larger, lane-dense shapes exercising the tiled online-softmax path --
    B2, L2, D2 = 2, 256, 128
    kq2, kk2, kv2 = jax.random.split(jax.random.PRNGKey(1), 3)
    Q2 = jax.random.normal(kq2, (B2, L2, D2), dtype=jnp.float32)
    K2 = jax.random.normal(kk2, (B2, L2, D2), dtype=jnp.float32)
    V2 = jax.random.normal(kv2, (B2, L2, D2), dtype=jnp.float32)
    out2 = jax.block_until_ready(
        scaled_dot_product_attention(Q2, K2, V2, D2 ** -0.5))   # tq=256, tk=128
    ref2 = _reference(Q2, K2, V2, D2 ** -0.5)
    np.testing.assert_allclose(np.asarray(out2), np.asarray(ref2),
                               rtol=3e-2, atol=3e-2)

    print("KERNEL_OK")
</pallas_src>

<mosaic_0001>
module attributes {stable_mosaic.version = 11 : i64} {
  func.func @_sdpa_kernel(%arg0: i32, %arg1: i32, %arg2: i32, %arg3: memref<1x8x32xf32, #tpu.memory_space<vmem>>, %arg4: memref<1x32x8xf32, #tpu.memory_space<vmem>>, %arg5: memref<1x8x32xf32, #tpu.memory_space<vmem>>, %arg6: memref<1x8x32xf32, #tpu.memory_space<vmem>>, %arg7: memref<8x32xbf16, #tpu.memory_space<vmem>>, %arg8: memref<8x128xf32, #tpu.memory_space<vmem>>, %arg9: memref<8x128xf32, #tpu.memory_space<vmem>>, %arg10: memref<8x32xf32, #tpu.memory_space<vmem>>) attributes {dimension_semantics = [#tpu.dimension_semantics<parallel>, #tpu.dimension_semantics<parallel>, #tpu.dimension_semantics<arbitrary>], iteration_bounds = array<i64: 2, 1, 1>, scalar_prefetch = 0 : i64, scratch_operands = 4 : i64, tpu.core_type = #tpu.core_type<tc>, window_params = [{transform_indices = @transform_0, window_bounds = array<i64: 1, 8, 32>}, {transform_indices = @transform_1, window_bounds = array<i64: 1, 32, 8>}, {transform_indices = @transform_2, window_bounds = array<i64: 1, 8, 32>}, {transform_indices = @transform_3, window_bounds = array<i64: 1, 8, 32>}]} {
    %c0_i32 = arith.constant 0 : i32
    %0 = arith.cmpi eq, %arg2, %c0_i32 : i32
    %1 = arith.extui %0 : i1 to i32
    %c0_i32_0 = arith.constant 0 : i32
    %2 = arith.cmpi ne, %1, %c0_i32_0 : i32
    scf.if %2 {
      %c0_25 = arith.constant 0 : index
      %c0_26 = arith.constant 0 : index
      %c0_27 = arith.constant 0 : index
      %43 = vector.load %arg3[%c0_25, %c0_26, %c0_27] : memref<1x8x32xf32, #tpu.memory_space<vmem>>, vector<1x8x32xf32>
      %44 = vector.shape_cast %43 : vector<1x8x32xf32> to vector<8x32xf32>
      %cst_28 = arith.constant 0.176776692 : f32
      %45 = vector.broadcast %cst_28 : f32 to vector<8x32xf32>
      %46 = arith.mulf %44, %45 : vector<8x32xf32>
      %47 = arith.truncf %46 : vector<8x32xf32> to vector<8x32xbf16>
      %c0_29 = arith.constant 0 : index
      %c0_30 = arith.constant 0 : index
      %48 = vector.load %arg7[%c0_29, %c0_30] : memref<8x32xbf16, #tpu.memory_space<vmem>>, vector<8x32xbf16>
      tpu.vector_store %arg7[%c0_29, %c0_30], %47 {strides = array<i32>} : memref<8x32xbf16, #tpu.memory_space<vmem>>, vector<8x32xbf16>,
      %cst_31 = arith.constant 0xFF800000 : f32
      %49 = vector.broadcast %cst_31 : f32 to vector<8x128xf32>
      %c0_32 = arith.constant 0 : index
      %c0_33 = arith.constant 0 : index
      %50 = vector.load %arg8[%c0_32, %c0_33] : memref<8x128xf32, #tpu.memory_space<vmem>>, vector<8x128xf32>
      tpu.vector_store %arg8[%c0_32, %c0_33], %49 {strides = array<i32>} : memref<8x128xf32, #tpu.memory_space<vmem>>, vector<8x128xf32>,
      %cst_34 = arith.constant 0.000000e+00 : f32
      %51 = vector.broadcast %cst_34 : f32 to vector<8x128xf32>
      %c0_35 = arith.constant 0 : index
      %c0_36 = arith.constant 0 : index
      %52 = vector.load %arg9[%c0_35, %c0_36] : memref<8x128xf32, #tpu.memory_space<vmem>>, vector<8x128xf32>
      tpu.vector_store %arg9[%c0_35, %c0_36], %51 {strides = array<i32>} : memref<8x128xf32, #tpu.memory_space<vmem>>, vector<8x128xf32>,
      %cst_37 = arith.constant 0.000000e+00 : f32
      %53 = vector.broadcast %cst_37 : f32 to vector<8x32xf32>
      %c0_38 = arith.constant 0 : index
      %c0_39 = arith.constant 0 : index
      %54 = vector.load %arg10[%c0_38, %c0_39] : memref<8x32xf32, #tpu.memory_space<vmem>>, vector<8x32xf32>
      tpu.vector_store %arg10[%c0_38, %c0_39], %53 {strides = array<i32>} : memref<8x32xf32, #tpu.memory_space<vmem>>, vector<8x32xf32>,
    } else {
    }
    %c0 = arith.constant 0 : index
    %c0_1 = arith.constant 0 : index
    %3 = vector.load %arg7[%c0, %c0_1] : memref<8x32xbf16, #tpu.memory_space<vmem>>, vector<8x32xbf16>
    %c0_2 = arith.constant 0 : index
    %c0_3 = arith.constant 0 : index
    %c0_4 = arith.constant 0 : index
    %4 = vector.load %arg4[%c0_2, %c0_3, %c0_4] : memref<1x32x8xf32, #tpu.memory_space<vmem>>, vector<1x32x8xf32>
    %5 = vector.shape_cast %4 : vector<1x32x8xf32> to vector<32x8xf32>
    %6 = arith.truncf %5 : vector<32x8xf32> to vector<32x8xbf16>
    %cst = arith.constant dense<0.000000e+00> : vector<8x8xf32>
    %7 = tpu.matmul %3, %6, %cst {dimension_numbers = #tpu.dot_dimension_numbers<[1], [0], [0], [1], [0, 0, 1, 1], [], []>} : vector<8x32xbf16>, vector<32x8xbf16>, vector<8x8xf32> -> vector<8x8xf32>
    %c0_5 = arith.constant 0 : index
    %c0_6 = arith.constant 0 : index
    %8 = vector.load %arg8[%c0_5, %c0_6] : memref<8x128xf32, #tpu.memory_space<vmem>>, vector<8x128xf32>
    %cst_7 = arith.constant dense<0xFF800000> : vector<8xf32>
    %9 = vector.multi_reduction <maximumf>, %7, %cst_7 [1] : vector<8x8xf32> to vector<8xf32>
    %10 = vector.shape_cast %9 : vector<8xf32> to vector<8x1xf32>
    %11 = vector.broadcast %10 : vector<8x1xf32> to vector<8x128xf32>
    %12 = arith.maximumf %8, %11 : vector<8x128xf32>
    %13 = arith.subf %8, %12 : vector<8x128xf32>
    %14 = math.exp %13 : vector<8x128xf32>
    %15 = vector.extract_strided_slice %12 {offsets = [0, 0], sizes = [8, 1], strides = [1, 1]} : vector<8x128xf32> to vector<8x1xf32>
    %16 = vector.shape_cast %15 : vector<8x1xf32> to vector<8x1xf32>
    %17 = vector.broadcast %16 : vector<8x1xf32> to vector<8x8xf32>
    %18 = arith.subf %7, %17 : vector<8x8xf32>
    %19 = math.exp %18 : vector<8x8xf32>
    %c0_8 = arith.constant 0 : index
    %c0_9 = arith.constant 0 : index
    %20 = vector.load %arg9[%c0_8, %c0_9] : memref<8x128xf32, #tpu.memory_space<vmem>>, vector<8x128xf32>
    %21 = arith.mulf %14, %20 : vector<8x128xf32>
    %cst_10 = arith.constant dense<0.000000e+00> : vector<8xf32>
    %22 = vector.multi_reduction <add>, %19, %cst_10 [1] : vector<8x8xf32> to vector<8xf32>
    %23 = vector.shape_cast %22 : vector<8xf32> to vector<8x1xf32>
    %24 = vector.broadcast %23 : vector<8x1xf32> to vector<8x128xf32>
    %25 = arith.addf %21, %24 : vector<8x128xf32>
    %c0_11 = arith.constant 0 : index
    %c0_12 = arith.constant 0 : index
    %26 = vector.load %arg9[%c0_11, %c0_12] : memref<8x128xf32, #tpu.memory_space<vmem>>, vector<8x128xf32>
    tpu.vector_store %arg9[%c0_11, %c0_12], %25 {strides = array<i32>} : memref<8x128xf32, #tpu.memory_space<vmem>>, vector<8x128xf32>,
    %27 = vector.extract_strided_slice %14 {offsets = [0, 0], sizes = [8, 1], strides = [1, 1]} : vector<8x128xf32> to vector<8x1xf32>
    %28 = vector.shape_cast %27 : vector<8x1xf32> to vector<8x1xf32>
    %29 = vector.broadcast %28 : vector<8x1xf32> to vector<8x32xf32>
    %c0_13 = arith.constant 0 : index
    %c0_14 = arith.constant 0 : index
    %30 = vector.load %arg10[%c0_13, %c0_14] : memref<8x32xf32, #tpu.memory_space<vmem>>, vector<8x32xf32>
    %31 = arith.mulf %29, %30 : vector<8x32xf32>
    %32 = arith.truncf %19 : vector<8x8xf32> to vector<8x8xbf16>
    %c0_15 = arith.constant 0 : index
    %c0_16 = arith.constant 0 : index
    %c0_17 = arith.constant 0 : index
    %33 = vector.load %arg5[%c0_15, %c0_16, %c0_17] : memref<1x8x32xf32, #tpu.memory_space<vmem>>, vector<1x8x32xf32>
    %34 = vector.shape_cast %33 : vector<1x8x32xf32> to vector<8x32xf32>
    %35 = arith.truncf %34 : vector<8x32xf32> to vector<8x32xbf16>
    %cst_18 = arith.constant dense<0.000000e+00> : vector<8x32xf32>
    %36 = tpu.matmul %32, %35, %cst_18 {dimension_numbers = #tpu.dot_dimension_numbers<[1], [0], [0], [1], [0, 0, 1, 1], [], []>} : vector<8x8xbf16>, vector<8x32xbf16>, vector<8x32xf32> -> vector<8x32xf32>
    %37 = arith.addf %31, %36 : vector<8x32xf32>
    %c0_19 = arith.constant 0 : index
    %c0_20 = arith.constant 0 : index
    %38 = vector.load %arg10[%c0_19, %c0_20] : memref<8x32xf32, #tpu.memory_space<vmem>>, vector<8x32xf32>
    tpu.vector_store %arg10[%c0_19, %c0_20], %37 {strides = array<i32>} : memref<8x32xf32, #tpu.memory_space<vmem>>, vector<8x32xf32>,
    %c0_21 = arith.constant 0 : index
    %c0_22 = arith.constant 0 : index
    %39 = vector.load %arg8[%c0_21, %c0_22] : memref<8x128xf32, #tpu.memory_space<vmem>>, vector<8x128xf32>
    tpu.vector_store %arg8[%c0_21, %c0_22], %12 {strides = array<i32>} : memref<8x128xf32, #tpu.memory_space<vmem>>, vector<8x128xf32>,
    %c0_i32_23 = arith.constant 0 : i32
    %40 = arith.cmpi eq, %arg2, %c0_i32_23 : i32
    %41 = arith.extui %40 : i1 to i32
    %c0_i32_24 = arith.constant 0 : i32
    %42 = arith.cmpi ne, %41, %c0_i32_24 : i32
    scf.if %42 {
      %c0_25 = arith.constant 0 : index
      %c0_26 = arith.constant 0 : index
      %43 = vector.load %arg9[%c0_25, %c0_26] : memref<8x128xf32, #tpu.memory_space<vmem>>, vector<8x128xf32>
      %44 = tpu.reciprocal %43 {approx = true} : vector<8x128xf32> -> vector<8x128xf32>
      %c0_27 = arith.constant 0 : index
      %c0_28 = arith.constant 0 : index
      %45 = vector.load %arg10[%c0_27, %c0_28] : memref<8x32xf32, #tpu.memory_space<vmem>>, vector<8x32xf32>
      %46 = vector.extract_strided_slice %44 {offsets = [0, 0], sizes = [8, 1], strides = [1, 1]} : vector<8x128xf32> to vector<8x1xf32>
      %47 = vector.shape_cast %46 : vector<8x1xf32> to vector<8x1xf32>
      %48 = vector.broadcast %47 : vector<8x1xf32> to vector<8x32xf32>
      %49 = arith.mulf %45, %48 : vector<8x32xf32>
      %c0_29 = arith.constant 0 : index
      %c0_30 = arith.constant 0 : index
      %c0_31 = arith.constant 0 : index
      %50 = vector.load %arg6[%c0_29, %c0_30, %c0_31] : memref<1x8x32xf32, #tpu.memory_space<vmem>>, vector<1x8x32xf32>
      %51 = vector.shape_cast %50 : vector<1x8x32xf32> to vector<8x32xf32>
      %52 = vector.shape_cast %49 : vector<8x32xf32> to vector<1x8x32xf32>
      tpu.vector_store %arg6[%c0_29, %c0_30, %c0_31], %52 {strides = array<i32>} : memref<1x8x32xf32, #tpu.memory_space<vmem>>, vector<1x8x32xf32>,
    } else {
    }
    return
  }
  func.func @transform_0(%arg0: i32, %arg1: i32, %arg2: i32) -> (i32, i32, i32) {
    %c0_i32 = arith.constant 0 : i32
    %c0_i32_0 = arith.constant 0 : i32
    return %arg0, %arg1, %c0_i32 : i32, i32, i32
  }
  func.func @transform_1(%arg0: i32, %arg1: i32, %arg2: i32) -> (i32, i32, i32) {
    %c0_i32 = arith.constant 0 : i32
    %c0_i32_0 = arith.constant 0 : i32
    return %arg0, %c0_i32, %arg2 : i32, i32, i32
  }
  func.func @transform_2(%arg0: i32, %arg1: i32, %arg2: i32) -> (i32, i32, i32) {
    %c0_i32 = arith.constant 0 : i32
    %c0_i32_0 = arith.constant 0 : i32
    return %arg0, %arg2, %c0_i32 : i32, i32, i32
  }
  func.func @transform_3(%arg0: i32, %arg1: i32, %arg2: i32) -> (i32, i32, i32) {
    %c0_i32 = arith.constant 0 : i32
    %c0_i32_0 = arith.constant 0 : i32
    return %arg0, %arg1, %c0_i32 : i32, i32, i32
  }
}

</mosaic_0001>

<bundles_post_ra>
// kernel: tpu_custom_call.1
= control target key start
LH: loop header
LB: loop body
LE: loop exit
PB: predicated region body
PF: predicated region fallthrough
CT: control target
= control target key end

     0   :  { %8 = vsyncpa [#allocation7], 0  ;;  %s880_s0 = inlined_call_operand.vmem [shape: f32[2,8,32], index: 0, kind: input, shape index: {}]   ;;  %s881_s1 = inlined_call_operand.vmem [shape: f32[2,32,8], index: 1, kind: input, shape index: {}]   ;;  %s882_s2 = inlined_call_operand.vmem [shape: f32[2,8,32], index: 2, kind: input, shape index: {}]   ;;  %s883_s3 = inlined_call_operand.hbm [shape: f32[2,8,32], index: 3, kind: output, shape index: {}]  }
   0x1   :  { %10 = vsyncpa [#allocation7 + $0x1], 0  ;;  %s747_s12 = smov 0   ;;  %s749_s13 = smov 0  }
   0x2   :  { %s751_s14 = smov 0   ;;  %s753_s15 = smov 0  }
   0x3   :  { %s755_s16 = smov 0   ;;  %s757_s17 = smov 0  }
   0x4 LB: > { %s541_s18 = sadd.s32 4294967295, %s721_s17   ;;  %s542_s19 = sadd.s32 4294967294, %s721_s17   ;;  %s721_s17 = sphi %s757_s17, %s16_s17   ;;  %s717_s16 = sphi %s755_s16, %s890_s16   ;;  %s713_s15 = sphi %s753_s15, %s889_s15   ;;  %s709_s14 = sphi %s751_s14, %s888_s14   ;;  %s705_s13 = sphi %s749_s13, %s887_s13   ;;  %s701_s12 = sphi %s747_s12, %s886_s12  }
   0x5   : > { %s35_s20 = sadd.s32 1, %s717_s16  ;;  %s128_s21 = sadd.s32 1, %s709_s14 }
   0x6   : > { %p37_p0 = scmp.ge.s32.totalorder %s35_s20, 2  ;;  %p138_p1 = scmp.ne.s32.totalorder %s709_s14, %s705_s13 }
   0x7   : > { %p139_p2 = scmp.eq.s32.totalorder %s541_s18, 1  ;;  %p144_p3 = scmp.ne.s32.totalorder %s705_s13, %s701_s12 }
   0x8   : > { %s892_s20 = smov (%p37_p0, %s35_s20), 0  ;;  %p145_p5 = scmp.eq.s32.totalorder %s542_s19, 1 }
   0x9   : > { %p787_p4 = por %p139_p2, %p138_p1  ;;  %s123_s23 = ssub.s32 %s717_s16, %s892_s20 }
   0xa   : > { %p545_p6 = scmp.ge.s32.totalorder %s721_s17, 1  ;;  %p126_p7 = scmp.eq.s32.totalorder %s123_s23, 0 }
   0xb   : > { %p794_p8 = por %p145_p5, %p144_p3  ;;  %p194_p9 = scmp.lt.s32.totalorder %s721_s17, 3 }
   0xc   : > { %s800_s25 = scalar_select %p126_p7, %s709_s14, %s128_s21  }
   0xd   : > { %p195_p10 = pnand %p545_p6, %p194_p9 }
   0xe   : > { %p235_p11 = scmp.lt.s32.totalorder (!%p195_p10), %s713_s15, 1  ;;  %vm269_vm0 = vcmask (!%p195_p10), 261120   ;;  %v723_v0 = vmov (!%p195_p10), 0.0   ;;  %vm724_vm1 = vmmov (!%p195_p10), 0   ;;  %vm265_vm2 = vcmask (!%p195_p10), 257024   ;;  %s232_s11 = sand.u32 (!%p195_p10), 1, %s705_s13  }
   0xf   : > { %198 = sbr.rel (%p195_p10) target bundleno = 837 (0x345), region = 32  ;;  %563 = vmatprep.subr.bf16.mxu0 (!%p195_p10), %v723_v0  ;;  %567 = vmatprep.mubr.msk.bf16.mxu0 (!%p195_p10), %vm724_vm1, %v723_v0  ;;  %270 = vst.msk [vmem:[#allocation5] sm:$0xff] (!%p195_p10), %vm269_vm0, %v723_v0  ;;  %v725_v11 = vmov (!%p195_p10), 0   ;;  %vm323_vm3 = vcmask (!%p195_p10), 64512   ;;  %vm359_vm4 = vcmask (!%p195_p10), 1043456   ;;  %s546_s18 = sshll.u32 (!%p195_p10), %s232_s11, 3 }
  0x10   : > { %571 = vmatprep.subr.bf16.mxu1 (!%p195_p10), %v723_v0  ;;  %573 = vmatprep.mubr.msk.bf16.mxu1 (!%p195_p10), %vm724_vm1, %v723_v0  ;;  %s554_s19 = sshll.u32 (!%p195_p10), %s713_s15, 7  ;;  %s234_s21 = scalar_lea.vmem (!%p195_p10), [#allocation6], %s546_s18 }
  0x11   : > { %635 = vset.pattern.permute.xlu0 (!%p195_p10), %v725_v11  ;;  %636 = vset.pattern.permute.xlu1 (!%p195_p10), %v725_v11  ;;  %s434_s23 = sshll.u32 (!%p195_p10), %s234_s21, 4  ;;  %s420_s29 = scalar_lea.sflag (!%p195_p10), [#allocation7], %s232_s11  ;;  %s834_s23 = int_to_ptr.vmem [resolvable:$true] %s434_s23 }
  0x12   : > { %s643_s30 = scalar_lea.vmem (!%p195_p10), %s834_s23, 128 }
  0x13   : > { %p644_p12 = scmp.ne.s32.totalorder (!%p195_p10), %s834_s23, %s643_s30 }
  0x15   : > { %p645_p13 = pnand (!%p195_p10), %p644_p12, %p787_p4 }
  0x16   : > { %s805_s26 = scalar_select %p235_p11, %s713_s15, 1  ;;  %v351_v34 = vld [vmem:[#allocation5] sm:$0xff] }
  0x17   : > { %p646_p0 = pneg %p645_p13  ;;  %s726_s15 = smov [#allocation6]  }
  0x18   : > { %s547_s27 = sshll.u32 %s805_s26, 3  ;;  %s557_s28 = sshll.u32 %s805_s26, 5 }
  0x19   : > { %s241_s4 = scalar_lea.vmem %s880_s0, %s547_s27  ;;  %s249_s7 = scalar_lea.vmem %s881_s1, %s557_s28 }
  0x1a   : > { %v262_v1 = vld [vmem:[%s241_s4] sm:$0xff]  ;;  %v273_v3 = vld [vmem:[%s249_s7 + $0x8] sm:$0xff]  ;;  %v274_v6 = vld [vmem:[%s249_s7 + $0x10] sm:$0xff]  ;;  %s256_s10 = scalar_lea.vmem %s882_s2, %s547_s27  ;;  %s832_s28 = scalar_lea.hbm %s883_s3, %s554_s19 }
  0x1b   : > { %v272_v2 = vld [vmem:[%s249_s7] sm:$0xff]  ;;  %v263_v4 = vmul.f32 0.17677669, %v262_v1  ;;  %v275_v7 = vld [vmem:[%s249_s7 + $0x18] sm:$0xff]  ;;  %s647_s4 = sshll.u32 %s726_s15, 4  ;;  %s648_s4 = int_to_ptr.vmem [resolvable:$false] %s647_s4 }
  0x1c   : > { %v276_v5 = vpack.c.bf16 %v273_v3, %v272_v2  ;;  %v277_v9 = vpack.c.bf16 %v275_v7, %v274_v6  ;;  %v354_v18 = vld [vmem:[%s256_s10] sm:$0xff]  ;;  %s649_s5 = scalar_lea.vmem %s648_s4, 256  ;;  %p650_p1 = scmp.lt.s32.totalorder %s834_s23, %s648_s4 }
  0x1d   : > { %v264_v8 = vpack.c.bf16 %v263_v4, %v263_v4  ;;  %v355_v19 = vpack.c.bf16 %v354_v18, %v354_v18  ;;  %p651_p2 = scmp.lt.s32.totalorder %s649_s5, %s643_s30 }
  0x1e   : > { %564 = vmatpush3.bf16.msra.mxu0 %v276_v5 }
  0x1f   : > { %565 = vmatprep.subr.bf16.mxu0 %v723_v0  ;;  %266 = vst.msk [vmem:[#allocation2] sm:$0xf] %vm265_vm2, %v264_v8  ;;  %v361_v20 = vsel %vm359_vm4, %v355_v19, 0  ;;  %p652_p3 = por %p651_p2, %p650_p1 }
  0x20   : > { %572 = vmatpush3.bf16.msra.mxu1 %v361_v20 }
  0x21   : > { %p653_p5 = pnand %p652_p3, %p646_p0 }
  0x22   : > { %566 = vmatpush3.bf16.msra.mxu0 %v277_v9 }
  0x26   : > { %v271_v10 = vld [vmem:[#allocation2] sm:$0xf] }
  0x27   : > { %568 = vmatmul.mubr.msk.bf16.vlgmr.msra.gmra.mrb[0].mxu0 %vm269_vm0, %v271_v10 }
  0xfa   : > { %v316_v12 = vpop.f32.mrb[0].mxu0 }
  0xfb   : > { %v569_v13 = vpop.f32.mrb[1].mxu0  ;;  %v324_v14 = vsel %vm323_vm3, %v316_v12, -inf }
  0xfc   : > { %325 = vmax.xlane.f32.xlu0 %v324_v14  ;;  %v319_v15 = vpop.f32.mrb[2].mxu0 }
  0xfd   : > { %v570_v16 = vpop.f32.mrb[3].mxu0 }
 0x189   : > { %v326_v17 = vpop.xlane.xlu0 %325 }
 0x18a   : > { %333 = vperm.xlu0 %635, %v326_v17   ;;  %v328_v25 = vsub.f32 -inf, %v326_v17 }
 0x18c   : > { %v329_v28 = vmul.f32 1.442695, %v328_v25 }
 0x209   : > { %v334_v21 = vpop.permute.xlu0 %333 }
 0x20a   : > { %v336_v22 = vsub.f32 %v316_v12, %v334_v21 }
 0x20c   : > { %v337_v23 = vmul.f32 1.442695, %v336_v22 }
 0x20e   : > { %637 = vpow2.f32 %v337_v23 }
 0x20f   : > { %639 = vpow2.f32 %v329_v28 }
 0x218   : > { %v638_v24 = vpop.eup %637 }
 0x219   : > { %v341_v26 = vsel %vm323_vm3, %v638_v24, 0.0  ;;  %v353_v27 = vpack.c.bf16 %v638_v24, %v638_v24  ;;  %v640_v29 = vpop.eup %639 }
 0x21a   : > { %342 = vadd.xlane.f32.xlu1 %v341_v26  ;;  %v340_v30 = vmul.f32 0.0, %v640_v29 }
 0x21b   : > { %574 = vmatmul.mubr.msk.bf16.vlgmr.msra.gmra.mrb[0].mxu1 %vm323_vm3, %v353_v27 }
 0x22b   : > { %348 = vperm.xlu1 %636, %v640_v29  }
 0x2a7   : > { %v343_v31 = vpop.xlane.xlu1 %342 }
 0x2a8   : > { %v344_v32 = vadd.f32 %v343_v31, %v340_v30 }
 0x2aa   : > { %641 = vrcp.f32 %v344_v32 }
 0x2ab   : > { %v349_v35 = vpop.permute.xlu1 %348 }
 0x2ac   : > { %v352_v36 = vmul.f32 %v351_v34, %v349_v35 }
 0x2b4   : > { %v642_v33 = vpop.eup %641 }
 0x2b5   : > { %414 = vperm.xlu1 %636, %v642_v33  }
 0x2ee   : > { %v397_v37 = vpop.f32.mrb[0].mxu1 }
 0x2ef   : > { %v403_v38 = vadd.f32 %v397_v37, %v352_v36  ;;  %v575_v39 = vpop.f32.mrb[1].mxu1 }
 0x2f0   : > { %v400_v40 = vpop.f32.mrb[2].mxu1 }
 0x2f1   : > { %404 = vst.msk [vmem:[#allocation5] sm:$0xff] %vm269_vm0, %v403_v38  ;;  %v576_v41 = vpop.f32.mrb[3].mxu1 }
 0x2f8   : > { %v411_v42 = vld [vmem:[#allocation5] sm:$0xff] }
 0x334   : > { %v415_v43 = vpop.permute.xlu1 %414 }
 0x335   : > { %v417_v44 = vmul.f32 %v415_v43, %v411_v42 }
 0x337   : > { %418 = vst.msk [vmem:[%s234_s21] sm:$0xff] %vm269_vm0, %v417_v44 }
 0x338   : > { %656 = shalt.err (!%p653_p5)
}
 0x339   : > { %s657_s6 = scalar_lea.hbm %s832_s28, 128  ;;  %s661_s9 = scalar_lea.hbm %s883_s3, 256 }
 0x33a   : > { %p658_p6 = scmp.ne.s32.totalorder %s832_s28, %s657_s6  ;;  %p662_p10 = scmp.lt.u32.totalorder %s832_s28, %s883_s3 }
 0x33b   : > { %p663_p11 = scmp.lt.u32.totalorder %s661_s9, %s657_s6  ;;  %p665_p13 = scmp.lt.u32.totalorder %s657_s6, %s832_s28 }
 0x33c   : > { %p659_p7 = pnand %p658_p6, %p787_p4 }
 0x33d   : > { %p664_p12 = por %p663_p11, %p662_p10 }
 0x33e   : > { %p660_p9 = pneg %p659_p7 }
 0x33f   : > { %p666_p0 = por %p665_p13, %p664_p12 }
 0x341   : > { %p667_p1 = pnand %p666_p0, %p660_p9 }
 0x343   : > { %670 = shalt.err (!%p667_p1)
}
 0x344   : > { %577 = dma.vmem_to_hbm [thread:$0]  (%p787_p4), %s834_s23, 128, %s832_s28, %s420_s29  }
 0x345 PF: > { %p583_p2 = scmp.ge.s32.totalorder %s721_s17, 2  ;;  %s446_s18 = sand.u32 1, %s701_s12  }
 0x346   : > { %s447_s19 = scalar_lea.sflag [#allocation7], %s446_s18 }
 0x347   : > { %p580_p3 = pnand %p583_p2, %p794_p8 }
 0x349   : > { %696 = dma.done.wait (!%p580_p3), %s447_s19, 128  }
 0x34a   : > { %698 = vsyncadd (!%p580_p3), %s447_s19, 4294967168  ;;  %s16_s17 = sadd.s32 1, %s721_s17   ;;  %s886_s12 = smov %s705_s13 }
 0x34b   : > { %p13_p5 = scmp.ge.s32.totalorder %s16_s17, 4   ;;  %s887_s13 = smov %s709_s14 }
 0x34c   : > { %s888_s14 = smov %s800_s25  ;;  %s889_s15 = smov %s717_s16 }
 0x34d   : > { %s890_s16 = smov %s892_s20  ;;  %15 = sbr.rel (!%p13_p5) target bundleno = 4 (0x4), region = 81 }
 0x354   :  { %452 = vsyncpa [#allocation7], 1 }
 0x355   :  { %454 = vsyncpa [#allocation7 + $0x1], 1 }

</bundles_post_ra>
